<compile_context>
chip_gen: v6e
topology: v6e:2x2x1
jax: 0.10.0
libtpu: 0.0.40
codegen_flags: <defaults>
</compile_context>

<pallas_src>
import jax
import jax.numpy as jnp
from jax import lax
from jax.experimental import pallas as pl
from jax.experimental.pallas import tpu as pltpu

LN_EPS = 1e-5


# --------------------------------------------------------------------------
# Kernel: fused (x @ W_prepared + b) + LayerNorm over the last dim.
# Grid = (num_m, num_k); K (reduction) is the last axis. The output tile is
# resident across K (constant index_map along k), so it is the f32 accumulator.
# --------------------------------------------------------------------------
def _tokenizer_kernel(x_ref, w_ref, pgb_ref, o_ref):
    k = pl.program_id(1)
    nk = pl.num_programs(1)

    @pl.when(k == 0)
    def _():
        o_ref[...] = jnp.zeros_like(o_ref)

    # In-kernel f32 -> bf16 pack of the activations (VPU, hidden under the
    # W-tile DMA); MXU accumulates in f32 straight into the resident out tile.
    o_ref[...] += jnp.dot(
        x_ref[...].astype(jnp.bfloat16),
        w_ref[...],
        preferred_element_type=jnp.float32,
    )

    @pl.when(k == nk - 1)
    def _():
        bias = pgb_ref[0:1, :]                                # (1, D_out) f32
        gamma = pgb_ref[1:2, :]
        beta = pgb_ref[2:3, :]
        y = o_ref[...] + bias                                 # (block_m, D_out) f32
        mean = jnp.mean(y, axis=-1, keepdims=True)
        d = y - mean
        var = jnp.mean(d * d, axis=-1, keepdims=True)
        inv = lax.rsqrt(var + LN_EPS)
        o_ref[...] = d * inv * gamma + beta


# --------------------------------------------------------------------------
# One-time parameter preparation (model init, NOT the per-call hot path).
#   weight: PyTorch layout (D_out, D_in), columns in patch-flatten order
#           (c, nh, nw, ph, pw).
# Returns:
#   w_prepared: (D_in, D_out) bf16, columns reordered so the activation can be
#               a plain NCHW reshape (no per-call transpose of anything).
#   pgb:        (3, D_out) f32 packed [bias; gamma; beta].
# --------------------------------------------------------------------------
def prepare_tokenizer_params(weight, bias, gamma, beta, *, image_shape,
                             patch_size=16, stream_dtype=jnp.bfloat16):
    C, H, W = image_shape
    p = patch_size
    nH, nW = H // p, W // p
    D_out, D_in = weight.shape
    assert D_in == C * H * W, "linear in_features must match flattened image"

    # Reorder input columns: (c, nh, nw, ph, pw) -> (c, nh, ph, nw, pw) = (c, h, w)
    w = weight.reshape(D_out, C, nH, nW, p, p)
    w = jnp.transpose(w, (0, 1, 2, 4, 3, 5)).reshape(D_out, D_in)
    w = jnp.transpose(w).astype(stream_dtype)                 # (D_in, D_out)

    pgb = jnp.stack([bias, gamma, beta]).astype(jnp.float32)  # (3, D_out)
    return w, pgb


# --------------------------------------------------------------------------
# K-block selection: largest block that divides D_in, is 256/128-aligned when
# the K axis is split, and keeps the pipelined VMEM footprint under budget.
# --------------------------------------------------------------------------
def _pick_block_k(D_in, block_m, D_out, budget_bytes, hard_cap=32768):
    fixed = 2 * block_m * D_out * 4 + 2 * 3 * D_out * 4       # resident out + params

    def max_k(nbuf_w):
        per_k = 2 * block_m * 4 + nbuf_w * D_out * 2          # x f32 dbl-buf + W bf16
        return max((budget_bytes - fixed) // per_k, 256)

    if D_in <= min(max_k(2), hard_cap):
        return D_in                                           # single K block

    cap = int(min(max_k(3), hard_cap))                        # 3-deep W buffering
    for align in (256, 128):
        divs = [d for d in range(align, cap + 1, align) if D_in % d == 0]
        if divs:
            return max(divs)
    # TODO(synk): D_in not a multiple of 128 would need explicit K padding; fall
    # back to the largest plain divisor (may lower to masked/strided DMAs).
    return max(d for d in range(1, cap + 1) if D_in % d == 0)


# --------------------------------------------------------------------------
# Forward: image (B, C, H, W) -> tokens (B, D_out)
# --------------------------------------------------------------------------
def image_tokenizer_forward(image, w_prepared, pgb):
    B = image.shape[0]
    D_in, D_out = w_prepared.shape

    # Free reshape: NCHW flatten order matches the prepared weight's columns.
    x = image.reshape(B, D_in)

    # Chip-aware VMEM budget (v7x: 64 MiB per TC, v5e/v6e: 128 MiB).
    try:
        vmem_cap = int(pltpu.get_tpu_info().vmem_capacity_bytes)
    except Exception:
        vmem_cap = 128 << 20
    budget = int(0.6 * vmem_cap)

    # Optional parallel row axis so a 2-TC chip (v7x) can shard the batch.
    if B >= 16 and B % 16 == 0:
        num_m, block_m = 2, B // 2
    else:
        num_m, block_m = 1, B

    block_k = _pick_block_k(D_in, block_m, D_out, budget)
    num_k = D_in // block_k
    nbuf_w = 3 if num_k > 1 else 2

    # Footprint: double-buffered f32 x tiles + nbuf_w bf16 W tiles + resident
    # f32 output (= accumulator) + packed params (both double-buffered).
    footprint = (2 * block_m * block_k * 4
                 + nbuf_w * block_k * D_out * 2
                 + 2 * block_m * D_out * 4
                 + 2 * 3 * D_out * 4)
    vmem_limit = int(min(max(2 * footprint, 16 << 20), budget))
    vmem_limit = max(vmem_limit, footprint + (2 << 20))

    if num_k > 1:
        try:
            w_spec = pl.BlockSpec((block_k, D_out), lambda m, k: (k, 0),
                                  pipeline_mode=pl.Buffered(3))
        except TypeError:  # older jax without pipeline_mode: plain double-buffer
            w_spec = pl.BlockSpec((block_k, D_out), lambda m, k: (k, 0))
    else:
        w_spec = pl.BlockSpec((block_k, D_out), lambda m, k: (k, 0))

    return pl.pallas_call(
        _tokenizer_kernel,
        out_shape=jax.ShapeDtypeStruct((B, D_out), jnp.float32),
        grid_spec=pltpu.PrefetchScalarGridSpec(
            num_scalar_prefetch=0,
            grid=(num_m, num_k),
            in_specs=[
                pl.BlockSpec((block_m, block_k), lambda m, k: (m, k)),  # x tile (f32)
                w_spec,                                                  # W tile (bf16)
                pl.BlockSpec((3, D_out), lambda m, k: (0, 0)),           # bias/g/beta
            ],
            out_specs=pl.BlockSpec((block_m, D_out), lambda m, k: (m, 0)),
        ),
        compiler_params=pltpu.CompilerParams(
            dimension_semantics=("parallel", "arbitrary"),
            vmem_limit_bytes=vmem_limit,
        ),
    )(x, w_prepared, pgb)


# --------------------------------------------------------------------------
# Pure-JAX f32 reference that mirrors the PyTorch forward exactly
# (original weight layout, patch-order flatten).
# --------------------------------------------------------------------------
def _reference(image, weight, bias, gamma, beta, patch_size=16):
    B, C, H, W = image.shape
    p = patch_size
    nH, nW = H // p, W // p
    patches = image.reshape(B, C, nH, p, nW, p)
    patches = jnp.transpose(patches, (0, 1, 2, 4, 3, 5)).reshape(B, -1)
    y = patches @ weight.T + bias
    mean = jnp.mean(y, axis=-1, keepdims=True)
    var = jnp.mean((y - mean) ** 2, axis=-1, keepdims=True)
    return (y - mean) / jnp.sqrt(var + LN_EPS) * gamma + beta


if __name__ == "__main__":
    # Small shapes consistent with the module: image_size=32, patch_size=16,
    # C=3 -> n_patches=4, D_in = 4*3*16*16 = 3072; image_dim (D_out) = 128.
    B, C, H, W = 2, 3, 32, 32
    patch_size = 16
    D_in = C * H * W          # 3072
    D_out = 128               # image_dim

    key = jax.random.PRNGKey(0)
    k_img, k_w, k_b = jax.random.split(key, 3)

    image = jax.random.normal(k_img, (B, C, H, W), dtype=jnp.float32)

    # Deterministic PyTorch-like init: Linear U(-1/sqrt(in), 1/sqrt(in)),
    # LayerNorm weight = 1, bias = 0.
    bound = 1.0 / (D_in ** 0.5)
    weight = jax.random.uniform(k_w, (D_out, D_in), jnp.float32, -bound, bound)
    bias = jax.random.uniform(k_b, (D_out,), jnp.float32, -bound, bound)
    gamma = jnp.ones((D_out,), jnp.float32)
    beta = jnp.zeros((D_out,), jnp.float32)

    # One-time prep (model init): column permutation + transpose + bf16 cast.
    w_prepared, pgb = prepare_tokenizer_params(
        weight, bias, gamma, beta, image_shape=(C, H, W),
        patch_size=patch_size, stream_dtype=jnp.bfloat16)
    w_prepared = jax.block_until_ready(w_prepared)

    fwd = jax.jit(image_tokenizer_forward)
    out = jax.block_until_ready(fwd(image, w_prepared, pgb))

    ref = jax.block_until_ready(
        _reference(image, weight, bias, gamma, beta, patch_size=patch_size)
    )
    assert out.shape == (B, D_out)
    # bf16-streamed operands with f32 accumulation / LayerNorm: tolerance is
    # loosened vs. the pure-f32 reference.
    assert jnp.allclose(out, ref, atol=3e-2, rtol=3e-2), "mismatch vs reference"

    print("KERNEL_OK")
</pallas_src>

<mosaic_0001>
module attributes {stable_mosaic.version = 11 : i64} {
  func.func @_tokenizer_kernel(%arg0: i32, %arg1: i32, %arg2: memref<2x3072xf32, #tpu.memory_space<vmem>>, %arg3: memref<3072x128xbf16, #tpu.memory_space<vmem>>, %arg4: memref<3x128xf32, #tpu.memory_space<vmem>>, %arg5: memref<2x128xf32, #tpu.memory_space<vmem>>) attributes {dimension_semantics = [#tpu.dimension_semantics<parallel>, #tpu.dimension_semantics<arbitrary>], iteration_bounds = array<i64: 1, 1>, scalar_prefetch = 0 : i64, scratch_operands = 0 : i64, tpu.core_type = #tpu.core_type<tc>, window_params = [{transform_indices = @transform_0, window_bounds = array<i64: 2, 3072>}, {transform_indices = @transform_1, window_bounds = array<i64: 3072, 128>}, {pipeline_mode = #tpu.pipeline_mode<synchronous>, transform_indices = @transform_2, window_bounds = array<i64: 3, 128>}, {transform_indices = @transform_3, window_bounds = array<i64: 2, 128>}]} {
    %c0_i32 = arith.constant 0 : i32
    %0 = arith.cmpi eq, %arg1, %c0_i32 : i32
    %1 = arith.extui %0 : i1 to i32
    %c0_i32_0 = arith.constant 0 : i32
    %2 = arith.cmpi ne, %1, %c0_i32_0 : i32
    scf.if %2 {
      %cst_10 = arith.constant 0.000000e+00 : f32
      %13 = vector.broadcast %cst_10 : f32 to vector<2x128xf32>
      %c0_11 = arith.constant 0 : index
      %c0_12 = arith.constant 0 : index
      %14 = vector.load %arg5[%c0_11, %c0_12] : memref<2x128xf32, #tpu.memory_space<vmem>>, vector<2x128xf32>
      tpu.vector_store %arg5[%c0_11, %c0_12], %13 {strides = array<i32>} : memref<2x128xf32, #tpu.memory_space<vmem>>, vector<2x128xf32>,
    } else {
    }
    %c0 = arith.constant 0 : index
    %c0_1 = arith.constant 0 : index
    %3 = vector.load %arg5[%c0, %c0_1] : memref<2x128xf32, #tpu.memory_space<vmem>>, vector<2x128xf32>
    %c0_2 = arith.constant 0 : index
    %c0_3 = arith.constant 0 : index
    %4 = vector.load %arg2[%c0_2, %c0_3] : memref<2x3072xf32, #tpu.memory_space<vmem>>, vector<2x3072xf32>
    %5 = arith.truncf %4 : vector<2x3072xf32> to vector<2x3072xbf16>
    %c0_4 = arith.constant 0 : index
    %c0_5 = arith.constant 0 : index
    %6 = vector.load %arg3[%c0_4, %c0_5] : memref<3072x128xbf16, #tpu.memory_space<vmem>>, vector<3072x128xbf16>
    %cst = arith.constant dense<0.000000e+00> : vector<2x128xf32>
    %7 = tpu.matmul %5, %6, %cst {dimension_numbers = #tpu.dot_dimension_numbers<[1], [0], [0], [1], [0, 0, 1, 1], [], []>} : vector<2x3072xbf16>, vector<3072x128xbf16>, vector<2x128xf32> -> vector<2x128xf32>
    %8 = arith.addf %3, %7 : vector<2x128xf32>
    %c0_6 = arith.constant 0 : index
    %c0_7 = arith.constant 0 : index
    %9 = vector.load %arg5[%c0_6, %c0_7] : memref<2x128xf32, #tpu.memory_space<vmem>>, vector<2x128xf32>
    tpu.vector_store %arg5[%c0_6, %c0_7], %8 {strides = array<i32>} : memref<2x128xf32, #tpu.memory_space<vmem>>, vector<2x128xf32>,
    %c0_i32_8 = arith.constant 0 : i32
    %10 = arith.cmpi eq, %arg1, %c0_i32_8 : i32
    %11 = arith.extui %10 : i1 to i32
    %c0_i32_9 = arith.constant 0 : i32
    %12 = arith.cmpi ne, %11, %c0_i32_9 : i32
    scf.if %12 {
      %c0_10 = arith.constant 0 : index
      %c0_11 = arith.constant 0 : index
      %13 = vector.load %arg4[%c0_10, %c0_11] : memref<3x128xf32, #tpu.memory_space<vmem>>, vector<1x128xf32>
      %c1 = arith.constant 1 : index
      %c0_12 = arith.constant 0 : index
      %14 = vector.load %arg4[%c1, %c0_12] : memref<3x128xf32, #tpu.memory_space<vmem>>, vector<1x128xf32>
      %c2 = arith.constant 2 : index
      %c0_13 = arith.constant 0 : index
      %15 = vector.load %arg4[%c2, %c0_13] : memref<3x128xf32, #tpu.memory_space<vmem>>, vector<1x128xf32>
      %c0_14 = arith.constant 0 : index
      %c0_15 = arith.constant 0 : index
      %16 = vector.load %arg5[%c0_14, %c0_15] : memref<2x128xf32, #tpu.memory_space<vmem>>, vector<2x128xf32>
      %17 = vector.broadcast %13 : vector<1x128xf32> to vector<2x128xf32>
      %18 = arith.addf %16, %17 : vector<2x128xf32>
      %cst_16 = arith.constant dense<0.000000e+00> : vector<2xf32>
      %19 = vector.multi_reduction <add>, %18, %cst_16 [1] : vector<2x128xf32> to vector<2xf32>
      %20 = vector.shape_cast %19 : vector<2xf32> to vector<2x1xf32>
      %cst_17 = arith.constant 1.280000e+02 : f32
      %21 = vector.broadcast %cst_17 : f32 to vector<2x1xf32>
      %22 = arith.divf %20, %21 : vector<2x1xf32>
      %23 = vector.broadcast %22 : vector<2x1xf32> to vector<2x128xf32>
      %24 = arith.subf %18, %23 : vector<2x128xf32>
      %25 = arith.mulf %24, %24 : vector<2x128xf32>
      %cst_18 = arith.constant dense<0.000000e+00> : vector<2xf32>
      %26 = vector.multi_reduction <add>, %25, %cst_18 [1] : vector<2x128xf32> to vector<2xf32>
      %27 = vector.shape_cast %26 : vector<2xf32> to vector<2x1xf32>
      %cst_19 = arith.constant 1.280000e+02 : f32
      %28 = vector.broadcast %cst_19 : f32 to vector<2x1xf32>
      %29 = arith.divf %27, %28 : vector<2x1xf32>
      %cst_20 = arith.constant 9.99999974E-6 : f32
      %30 = vector.broadcast %cst_20 : f32 to vector<2x1xf32>
      %31 = arith.addf %29, %30 : vector<2x1xf32>
      %32 = math.rsqrt %31 : vector<2x1xf32>
      %33 = vector.broadcast %32 : vector<2x1xf32> to vector<2x128xf32>
      %34 = arith.mulf %24, %33 : vector<2x128xf32>
      %35 = vector.broadcast %14 : vector<1x128xf32> to vector<2x128xf32>
      %36 = arith.mulf %34, %35 : vector<2x128xf32>
      %37 = vector.broadcast %15 : vector<1x128xf32> to vector<2x128xf32>
      %38 = arith.addf %36, %37 : vector<2x128xf32>
      %c0_21 = arith.constant 0 : index
      %c0_22 = arith.constant 0 : index
      %39 = vector.load %arg5[%c0_21, %c0_22] : memref<2x128xf32, #tpu.memory_space<vmem>>, vector<2x128xf32>
      tpu.vector_store %arg5[%c0_21, %c0_22], %38 {strides = array<i32>} : memref<2x128xf32, #tpu.memory_space<vmem>>, vector<2x128xf32>,
    } else {
    }
    return
  }
  func.func @transform_0(%arg0: i32, %arg1: i32) -> (i32, i32) {
    %c0_i32 = arith.constant 0 : i32
    return %arg0, %arg1 : i32, i32
  }
  func.func @transform_1(%arg0: i32, %arg1: i32) -> (i32, i32) {
    %c0_i32 = arith.constant 0 : i32
    %c0_i32_0 = arith.constant 0 : i32
    return %arg1, %c0_i32 : i32, i32
  }
  func.func @transform_2(%arg0: i32, %arg1: i32) -> (i32, i32) {
    %c0_i32 = arith.constant 0 : i32
    %c0_i32_0 = arith.constant 0 : i32
    %c0_i32_1 = arith.constant 0 : i32
    return %c0_i32, %c0_i32_0 : i32, i32
  }
  func.func @transform_3(%arg0: i32, %arg1: i32) -> (i32, i32) {
    %c0_i32 = arith.constant 0 : i32
    %c0_i32_0 = arith.constant 0 : i32
    return %arg0, %c0_i32 : i32, i32
  }
}

</mosaic_0001>

<bundles_post_ra>
// kernel: image_tokenizer_forward.1
= control target key start
LH: loop header
LB: loop body
LE: loop exit
PB: predicated region body
PF: predicated region fallthrough
CT: control target
= control target key end

     0   :  { %8 = vsyncpa [#allocation3], 0  ;;  %s3051_s0 = inlined_call_operand.vmem [shape: f32[2,3072], index: 0, kind: input, shape index: {}]   ;;  %s3052_s1 = inlined_call_operand.hbm [shape: bf16[3072,128], index: 1, kind: input, shape index: {}]   ;;  %s3053_s2 = inlined_call_operand.vmem [shape: f32[3,128], index: 2, kind: input, shape index: {}]   ;;  %s3054_s3 = inlined_call_operand.hbm [shape: f32[2,128], index: 3, kind: output, shape index: {}]  }
   0x1   :  { %9 = vsyncpa [#allocation4], 0  ;;  %s2978_s12 = smov [#allocation2]  }
   0x2   :  { %s17_s13 = sshll.u32 %s2978_s12, 4  ;;  %s18_s13 = int_to_ptr.vmem [resolvable:$true] %s17_s13 }
   0x3   :  { %s2942_s14 = scalar_lea.vmem %s18_s13, 24576  ;;  %p2947_p1 = scmp.lt.s32.totalorder %s18_s13, %s18_s13 }
   0x4   :  { %p2943_p0 = scmp.ne.s32.totalorder %s18_s13, %s2942_s14  ;;  %p2948_p2 = scmp.lt.s32.totalorder %s2942_s14, %s2942_s14 }
   0x6   :  { %p2949_p3 = por %p2948_p2, %p2947_p1 }
   0x8   :  { %p2950_p4 = pnand %p2949_p3, %p2943_p0 }
   0xa   :  { %2953 = shalt.err (!%p2950_p4)
}
   0xb   :  { %s2979_s15 = smov 64   ;;  %s2980_s16 = smov 4  }
   0xc   :  { %23 = dma.hbm_to_vmem [thread:$0]  %s3052_s1, 24576, %s18_s13, [#allocation3], %s2979_s15, %s2979_s15, %s2980_s16  }
   0xd   :  { %2974 = dma.done.wait [#allocation3], 24576  }
   0xe   :  { %2975 = vsyncadd [#allocation3], 4294942720  ;;  %v2734_v0 = vld [vmem:[#allocation2 + $0x78] sm:$0xff]   ;;  %v2738_v4 = vld [vmem:[#allocation2 + $0x70] sm:$0xff]   ;;  %v2981_v22 = vmov 1983009808   ;;  %v52_v24 = vlaneseq }
   0xf   :  { %v2735_v1 = vld [vmem:[#allocation2 + $0xf8] sm:$0xff]   ;;  %2464 = vmatprep.subr.bf16.mxu0 %v2734_v0  ;;  %v2739_v5 = vld [vmem:[#allocation2 + $0xf0] sm:$0xff]   ;;  %v2742_v8 = vld [vmem:[#allocation2 + $0x68] sm:$0xff]   ;;  %v50_v23 = vunpack.c.l.s4 %v2981_v22  ;;  %vm2228_vm0 = vcmask 1041408   ;;  %s2983_s8 = smov [#allocation5]  }
  0x10   :  { %v2736_v2 = vld [vmem:[#allocation2 + $0x38] sm:$0xff]   ;;  %2486 = vmatprep.subr.bf16.mxu1 %v2735_v1  ;;  %v2740_v6 = vld [vmem:[#allocation2 + $0x30] sm:$0xff]   ;;  %v2743_v9 = vld [vmem:[#allocation2 + $0xe8] sm:$0xff]   ;;  %v53_v30 = vshrl.u32 %v52_v24, 7  ;;  %s2260_s9 = sshll.u32 %s2983_s8, 4  ;;  %s2261_s9 = int_to_ptr.vmem [resolvable:$true] %s2260_s9 }
  0x11   :  { %v2737_v3 = vld [vmem:[#allocation2 + $0xb8] sm:$0xff]   ;;  %2465 = vmatpush3.bf16.msra.mxu0 %v2736_v2  ;;  %v2741_v7 = vld [vmem:[#allocation2 + $0xb0] sm:$0xff]   ;;  %v2744_v10 = vld [vmem:[#allocation2 + $0x28] sm:$0xff]   ;;  %v51_v29 = vunpack.c.0.s8 %v50_v23  ;;  %s2954_s10 = scalar_lea.vmem %s2261_s9, 32  ;;  %p2959_p6 = scmp.lt.s32.totalorder %s2261_s9, %s2261_s9 }
  0x12   :  { %2487 = vmatpush3.bf16.msra.mxu1 %v2737_v3  ;;  %2466 = vmatprep.subr.bf16.mxu0 %v2738_v4  ;;  %v2745_v11 = vld [vmem:[#allocation2 + $0xa8] sm:$0xff]   ;;  %v2746_v12 = vld [vmem:[#allocation2 + $0x60] sm:$0xff]   ;;  %v2750_v16 = vld [vmem:[#allocation2 + $0x58] sm:$0xff]   ;;  %p2955_p5 = scmp.ne.s32.totalorder %s2261_s9, %s2954_s10  ;;  %p2960_p7 = scmp.lt.s32.totalorder %s2954_s10, %s2954_s10 }
  0x13   :  { %2488 = vmatprep.subr.bf16.mxu1 %v2739_v5  ;;  %v2747_v13 = vld [vmem:[#allocation2 + $0xe0] sm:$0xff]   ;;  %v2751_v17 = vld [vmem:[#allocation2 + $0xd8] sm:$0xff]   ;;  %v2754_v20 = vld [vmem:[#allocation2 + $0x50] sm:$0xff]   ;;  %v3007_v35 = vsub.s32 %v51_v29, %v53_v30 }
  0x14   :  { %v2748_v14 = vld [vmem:[#allocation2 + $0x20] sm:$0xff]   ;;  %v2752_v18 = vld [vmem:[#allocation2 + $0x18] sm:$0xff]   ;;  %v2755_v21 = vld [vmem:[#allocation2 + $0xd0] sm:$0xff]   ;;  %p2961_p8 = por %p2960_p7, %p2959_p6 }
  0x15   :  { %2467 = vmatpush3.bf16.msra.mxu0 %v2740_v6  ;;  %v2749_v15 = vld [vmem:[#allocation2 + $0xa0] sm:$0xff]   ;;  %v2753_v19 = vld [vmem:[#allocation2 + $0x98] sm:$0xff]   ;;  %v2756_v25 = vld [vmem:[#allocation2 + $0x10] sm:$0xff]  }
  0x16   :  { %2489 = vmatpush3.bf16.msra.mxu1 %v2741_v7  ;;  %2468 = vmatprep.subr.bf16.mxu0 %v2742_v8  ;;  %v2757_v26 = vld [vmem:[#allocation2 + $0x90] sm:$0xff]   ;;  %v2758_v27 = vld [vmem:[#allocation2 + $0x48] sm:$0xff]   ;;  %v2762_v33 = vld [vmem:[#allocation2 + $0x40] sm:$0xff]   ;;  %p2962_p9 = pnand %p2961_p8, %p2955_p5 }
  0x17   :  { %2490 = vmatprep.subr.bf16.mxu1 %v2743_v9  ;;  %v2759_v28 = vld [vmem:[#allocation2 + $0xc8] sm:$0xff]   ;;  %v2763_v34 = vld [vmem:[#allocation2 + $0xc0] sm:$0xff]   ;;  %v2767_v41 = vld [vmem:[#allocation2 + $0x178] sm:$0xff]  }
  0x18   :  { %v2760_v31 = vld [vmem:[#allocation2 + $0x8] sm:$0xff]   ;;  %v2764_v36 = vld [vmem:[#allocation2] sm:$0xff]   ;;  %v2768_v42 = vld [vmem:[#allocation2 + $0x1f8] sm:$0xff]  }
  0x19   :  { %2469 = vmatpush3.bf16.msra.mxu0 %v2744_v10  ;;  %v2761_v32 = vld [vmem:[#allocation2 + $0x88] sm:$0xff]   ;;  %v2765_v37 = vld [vmem:[#allocation2 + $0x80] sm:$0xff]   ;;  %v2769_v46 = vld [vmem:[#allocation2 + $0x138] sm:$0xff]  }
  0x1a   :  { %2491 = vmatpush3.bf16.msra.mxu1 %v2745_v11  ;;  %2470 = vmatprep.subr.bf16.mxu0 %v2746_v12  ;;  %v36_v38 = vld [vmem:[%s3051_s0] sm:$0xff]  ;;  %v2770_v49 = vld [vmem:[#allocation2 + $0x1b8] sm:$0xff]   ;;  %v2771_v51 = vld [vmem:[#allocation2 + $0x170] sm:$0xff]  }
  0x1b   :  { %2492 = vmatprep.subr.bf16.mxu1 %v2747_v13  ;;  %v55_v39 = vrot.slane %v36_v38, %v3007_v35  ;;  %v48_v40 = vcombine.high %v36_v38, %v36_v38  ;;  %v2772_v53 = vld [vmem:[#allocation2 + $0x1f0] sm:$0xff]   ;;  %v2775_v56 = vld [vmem:[#allocation2 + $0x168] sm:$0xff]   ;;  %v2779_v60 = vld [vmem:[#allocation2 + $0x160] sm:$0xff]  }
  0x1c   :  { %v2773_v54 = vld [vmem:[#allocation2 + $0x130] sm:$0xff]   ;;  %v2776_v57 = vld [vmem:[#allocation2 + $0x1e8] sm:$0xff]   ;;  %v2780_v61 = vld [vmem:[#allocation2 + $0x1e0] sm:$0xff]  }
  0x1d   :  { %2471 = vmatpush3.bf16.msra.mxu0 %v2748_v14  ;;  %v63_v43 = vcombine.high %v55_v39, %v55_v39  ;;  %v62_v44 = vrot.slane %v48_v40, %v3007_v35  ;;  %v174_v45 = vpack.c.bf16 %v55_v39, %v55_v39  ;;  %v2774_v55 = vld [vmem:[#allocation2 + $0x1b0] sm:$0xff]   ;;  %v2777_v58 = vld [vmem:[#allocation2 + $0x128] sm:$0xff]   ;;  %v2781_v62 = vld [vmem:[#allocation2 + $0x120] sm:$0xff]  }
  0x1e   :  { %2493 = vmatpush3.bf16.msra.mxu1 %v2749_v15  ;;  %2472 = vmatprep.subr.bf16.mxu0 %v2750_v16  ;;  %v2778_v59 = vld [vmem:[#allocation2 + $0x1a8] sm:$0xff]   ;;  %v2782_v63 = vld [vmem:[#allocation2 + $0x1a0] sm:$0xff]   ;;  %v2783_v0 = vld [vmem:[#allocation2 + $0x158] sm:$0xff]  }
  0x1f   :  { %2494 = vmatprep.subr.bf16.mxu1 %v2751_v17  ;;  %v175_v47 = vpack.c.bf16 %v63_v43, %v63_v43  ;;  %v64_v48 = vcombine.high %v62_v44, %v62_v44  ;;  %v176_v50 = vpack.c.bf16 %v62_v44, %v62_v44  ;;  %v2784_v1 = vld [vmem:[#allocation2 + $0x1d8] sm:$0xff]   ;;  %v2787_v4 = vld [vmem:[#allocation2 + $0x150] sm:$0xff]   ;;  %v2791_v8 = vld [vmem:[#allocation2 + $0x148] sm:$0xff]  }
  0x20   :  { %v2785_v2 = vld [vmem:[#allocation2 + $0x118] sm:$0xff]   ;;  %v2788_v5 = vld [vmem:[#allocation2 + $0x1d0] sm:$0xff]   ;;  %v2792_v9 = vld [vmem:[#allocation2 + $0x1c8] sm:$0xff]  }
  0x21   :  { %2473 = vmatpush3.bf16.msra.mxu0 %v2752_v18  ;;  %1766 = vmatprep.mubr.bf16.mxu0 %v175_v47  ;;  %v177_v52 = vpack.c.bf16 %v64_v48, %v64_v48  ;;  %v2786_v3 = vld [vmem:[#allocation2 + $0x198] sm:$0xff]   ;;  %v2789_v6 = vld [vmem:[#allocation2 + $0x110] sm:$0xff]   ;;  %v2793_v10 = vld [vmem:[#allocation2 + $0x108] sm:$0xff]  }
  0x22   :  { %2495 = vmatpush3.bf16.msra.mxu1 %v2753_v19  ;;  %2474 = vmatprep.subr.bf16.mxu0 %v2754_v20  ;;  %v2790_v7 = vld [vmem:[#allocation2 + $0x190] sm:$0xff]   ;;  %v2794_v11 = vld [vmem:[#allocation2 + $0x188] sm:$0xff]   ;;  %v2795_v12 = vld [vmem:[#allocation2 + $0x140] sm:$0xff]  }
  0x23   :  { %2496 = vmatprep.subr.bf16.mxu1 %v2755_v21  ;;  %1806 = vmatprep.mubr.bf16.mxu1 %v177_v52  ;;  %v2796_v13 = vld [vmem:[#allocation2 + $0x1c0] sm:$0xff]   ;;  %v37_v15 = vld [vmem:[%s3051_s0 + $0x8] sm:$0xff]  ;;  %v2800_v19 = vld [vmem:[#allocation2 + $0x278] sm:$0xff]  }
  0x24   :  { %v2797_v14 = vld [vmem:[#allocation2 + $0x100] sm:$0xff]   ;;  %v72_v17 = vrot.slane %v37_v15, %v3007_v35  ;;  %v65_v18 = vcombine.high %v37_v15, %v37_v15  ;;  %v2801_v22 = vld [vmem:[#allocation2 + $0x2f8] sm:$0xff]   ;;  %v2804_v29 = vld [vmem:[#allocation2 + $0x270] sm:$0xff]  }
  0x25   :  { %2475 = vmatpush3.bf16.msra.mxu0 %v2756_v25  ;;  %v2798_v16 = vld [vmem:[#allocation2 + $0x180] sm:$0xff]   ;;  %v2802_v24 = vld [vmem:[#allocation2 + $0x238] sm:$0xff]   ;;  %v2811_v38 = vld [vmem:[#allocation2 + $0x2a8] sm:$0xff]  }
  0x26   :  { %2497 = vmatpush3.bf16.msra.mxu1 %v2757_v26  ;;  %2476 = vmatprep.subr.bf16.mxu0 %v2758_v27  ;;  %v80_v20 = vcombine.high %v72_v17, %v72_v17  ;;  %v79_v21 = vrot.slane %v65_v18, %v3007_v35  ;;  %v178_v23 = vpack.c.bf16 %v72_v17, %v72_v17  ;;  %v2803_v27 = vld [vmem:[#allocation2 + $0x2b8] sm:$0xff]   ;;  %v2812_v39 = vld [vmem:[#allocation2 + $0x260] sm:$0xff]   ;;  %v2820_v47 = vld [vmem:[#allocation2 + $0x250] sm:$0xff]  }
  0x27   :  { %2498 = vmatprep.subr.bf16.mxu1 %v2759_v28  ;;  %v2813_v40 = vld [vmem:[#allocation2 + $0x2e0] sm:$0xff]   ;;  %v2816_v43 = vld [vmem:[#allocation2 + $0x258] sm:$0xff]   ;;  %v2821_v48 = vld [vmem:[#allocation2 + $0x2d0] sm:$0xff]  }
  0x28   :  { %v179_v25 = vpack.c.bf16 %v80_v20, %v80_v20  ;;  %v81_v26 = vcombine.high %v79_v21, %v79_v21  ;;  %v180_v28 = vpack.c.bf16 %v79_v21, %v79_v21  ;;  %v2817_v44 = vld [vmem:[#allocation2 + $0x2d8] sm:$0xff]   ;;  %v2825_v52 = vld [vmem:[#allocation2 + $0x2c8] sm:$0xff]   ;;  %v2845_v17 = vld [vmem:[#allocation2 + $0x360] sm:$0xff]  }
  0x29   :  { %2477 = vmatpush3.bf16.msra.mxu0 %v2760_v31  ;;  %v2805_v31 = vld [vmem:[#allocation2 + $0x2f0] sm:$0xff]   ;;  %v2843_v15 = vld [vmem:[#allocation2 + $0x328] sm:$0xff]   ;;  %v2846_v18 = vld [vmem:[#allocation2 + $0x3e0] sm:$0xff]  }
  0x2a   :  { %2499 = vmatpush3.bf16.msra.mxu1 %v2761_v32  ;;  %2478 = vmatprep.subr.bf16.mxu0 %v2762_v33  ;;  %v181_v30 = vpack.c.bf16 %v81_v26, %v81_v26  ;;  %v2806_v32 = vld [vmem:[#allocation2 + $0x230] sm:$0xff]   ;;  %v2848_v20 = vld [vmem:[#allocation2 + $0x3a0] sm:$0xff]   ;;  %v2849_v21 = vld [vmem:[#allocation2 + $0x358] sm:$0xff]  }
  0x2b   :  { %2500 = vmatprep.subr.bf16.mxu1 %v2763_v34  ;;  %v2807_v33 = vld [vmem:[#allocation2 + $0x2b0] sm:$0xff]   ;;  %v2808_v34 = vld [vmem:[#allocation2 + $0x268] sm:$0xff]  }
  0x2c   :  { %v2854_v26 = vld [vmem:[#allocation2 + $0x3d0] sm:$0xff]  }
  0x2d   :  { %2479 = vmatpush3.bf16.msra.mxu0 %v2764_v36  ;;  %v2809_v36 = vld [vmem:[#allocation2 + $0x2e8] sm:$0xff]  }
  0x2e   :  { %2501 = vmatpush3.bf16.msra.mxu1 %v2765_v37  ;;  %2508 = vmatprep.subr.bf16.mxu0 %v2767_v41  ;;  %v2810_v37 = vld [vmem:[#allocation2 + $0x228] sm:$0xff]   ;;  %v2814_v41 = vld [vmem:[#allocation2 + $0x220] sm:$0xff]  }
  0x2f   :  { %2530 = vmatprep.subr.bf16.mxu1 %v2768_v42  ;;  %v2815_v42 = vld [vmem:[#allocation2 + $0x2a0] sm:$0xff]  }
  0x30   :  { %1767 = vmatmul.mubr.bf16.vlgmr.msra.gmra.mxu0 %v174_v45  ;;  %v2818_v45 = vld [vmem:[#allocation2 + $0x218] sm:$0xff]  }
  0x31   :  { %2509 = vmatpush3.bf16.msra.mxu0 %v2769_v46  ;;  %1807 = vmatmul.mubr.bf16.vlgmr.msra.gmra.mxu1 %v176_v50  ;;  %v2819_v46 = vld [vmem:[#allocation2 + $0x298] sm:$0xff]   ;;  %v2823_v50 = vld [vmem:[#allocation2 + $0x290] sm:$0xff]  }
  0x32   :  { %2510 = vmatprep.subr.bf16.mxu0 %v2771_v51  ;;  %2531 = vmatpush3.bf16.msra.mxu1 %v2770_v49  ;;  %v2822_v49 = vld [vmem:[#allocation2 + $0x210] sm:$0xff]   ;;  %v2824_v51 = vld [vmem:[#allocation2 + $0x248] sm:$0xff]  }
  0x33   :  { %2532 = vmatprep.subr.bf16.mxu1 %v2772_v53  ;;  %1846 = vmatprep.mubr.bf16.mxu0 %v179_v25  ;;  %v2826_v53 = vld [vmem:[#allocation2 + $0x208] sm:$0xff]   ;;  %v2853_v25 = vld [vmem:[#allocation2 + $0x350] sm:$0xff]  }
  0x34   :  { %1886 = vmatprep.mubr.bf16.mxu1 %v181_v30  ;;  %v2858_v30 = vld [vmem:[#allocation2 + $0x3c8] sm:$0xff]  }
  0x35   :  { %2511 = vmatpush3.bf16.msra.mxu0 %v2773_v54  ;;  %v2827_v54 = vld [vmem:[#allocation2 + $0x288] sm:$0xff]  }
  0x36   :  { %2512 = vmatprep.subr.bf16.mxu0 %v2775_v56  ;;  %2533 = vmatpush3.bf16.msra.mxu1 %v2774_v55  ;;  %v2828_v55 = vld [vmem:[#allocation2 + $0x240] sm:$0xff]  }
  0x37   :  { %2534 = vmatprep.subr.bf16.mxu1 %v2776_v57  ;;  %v2829_v56 = vld [vmem:[#allocation2 + $0x2c0] sm:$0xff]  }
  0x38   :  { %v2830_v57 = vld [vmem:[#allocation2 + $0x200] sm:$0xff]  }
  0x39   :  { %2513 = vmatpush3.bf16.msra.mxu0 %v2777_v58  ;;  %v38_v58 = vld [vmem:[%s3051_s0 + $0x10] sm:$0xff] }
  0x3a   :  { %2514 = vmatprep.subr.bf16.mxu0 %v2779_v60  ;;  %2535 = vmatpush3.bf16.msra.mxu1 %v2778_v59  ;;  %v2831_v59 = vld [vmem:[#allocation2 + $0x280] sm:$0xff]   ;;  %v89_v60 = vrot.slane %v38_v58, %v3007_v35 }
  0x3b   :  { %2536 = vmatprep.subr.bf16.mxu1 %v2780_v61  ;;  %v82_v61 = vcombine.high %v38_v58, %v38_v58  ;;  %v2876_v58 = vld [vmem:[#allocation2 + $0x428] sm:$0xff]  }
  0x3d   :  { %2515 = vmatpush3.bf16.msra.mxu0 %v2781_v62  ;;  %v2833_v62 = vld [vmem:[#allocation2 + $0x378] sm:$0xff]  }
  0x3e   :  { %2516 = vmatprep.subr.bf16.mxu0 %v2783_v0  ;;  %2537 = vmatpush3.bf16.msra.mxu1 %v2782_v63  ;;  %v97_v63 = vcombine.high %v89_v60, %v89_v60  ;;  %v96_v0 = vrot.slane %v82_v61, %v3007_v35  ;;  %v2879_v61 = vld [vmem:[#allocation2 + $0x4e0] sm:$0xff]  }
  0x3f   :  { %2538 = vmatprep.subr.bf16.mxu1 %v2784_v1  ;;  %v2834_v1 = vld [vmem:[#allocation2 + $0x3f8] sm:$0xff]  }
  0x41   :  { %2517 = vmatpush3.bf16.msra.mxu0 %v2785_v2  ;;  %v182_v2 = vpack.c.bf16 %v89_v60, %v89_v60  ;;  %v2877_v60 = vld [vmem:[#allocation2 + $0x4a8] sm:$0xff]  }
  0x42   :  { %2518 = vmatprep.subr.bf16.mxu0 %v2787_v4  ;;  %2539 = vmatpush3.bf16.msra.mxu1 %v2786_v3  ;;  %v2835_v3 = vld [vmem:[#allocation2 + $0x338] sm:$0xff]   ;;  %v183_v4 = vpack.c.bf16 %v97_v63, %v97_v63 }
  0x43   :  { %2540 = vmatprep.subr.bf16.mxu1 %v2788_v5  ;;  %v98_v5 = vcombine.high %v96_v0, %v96_v0  ;;  %v2882_v63 = vld [vmem:[#allocation2 + $0x458] sm:$0xff]  }
  0x45   :  { %2519 = vmatpush3.bf16.msra.mxu0 %v2789_v6  ;;  %v2836_v6 = vld [vmem:[#allocation2 + $0x3b8] sm:$0xff]  }
  0x46   :  { %2520 = vmatprep.subr.bf16.mxu0 %v2791_v8  ;;  %2541 = vmatpush3.bf16.msra.mxu1 %v2790_v7  ;;  %v184_v7 = vpack.c.bf16 %v96_v0, %v96_v0  ;;  %v2837_v8 = vld [vmem:[#allocation2 + $0x370] sm:$0xff]   ;;  %v2881_v0 = vld [vmem:[#allocation2 + $0x4a0] sm:$0xff]  }
  0x47   :  { %2542 = vmatprep.subr.bf16.mxu1 %v2792_v9  ;;  %v185_v9 = vpack.c.bf16 %v98_v5, %v98_v5  ;;  %v2887_v5 = vld [vmem:[#allocation2 + $0x4d0] sm:$0xff]  }
  0x49   :  { %2521 = vmatpush3.bf16.msra.mxu0 %v2793_v10  ;;  %v2838_v10 = vld [vmem:[#allocation2 + $0x3f0] sm:$0xff]  }
  0x4a   :  { %2522 = vmatprep.subr.bf16.mxu0 %v2795_v12  ;;  %2543 = vmatpush3.bf16.msra.mxu1 %v2794_v11  ;;  %v2839_v11 = vld [vmem:[#allocation2 + $0x330] sm:$0xff]  }
  0x4b   :  { %2544 = vmatprep.subr.bf16.mxu1 %v2796_v13  ;;  %v2840_v12 = vld [vmem:[#allocation2 + $0x3b0] sm:$0xff]   ;;  %v2841_v13 = vld [vmem:[#allocation2 + $0x368] sm:$0xff]  }
  0x4d   :  { %2523 = vmatpush3.bf16.msra.mxu0 %v2797_v14  ;;  %v2842_v14 = vld [vmem:[#allocation2 + $0x3e8] sm:$0xff]  }
  0x4e   :  { %2552 = vmatprep.subr.bf16.mxu0 %v2800_v19  ;;  %2545 = vmatpush3.bf16.msra.mxu1 %v2798_v16  ;;  %v2844_v16 = vld [vmem:[#allocation2 + $0x3a8] sm:$0xff]   ;;  %v2847_v19 = vld [vmem:[#allocation2 + $0x320] sm:$0xff]  }
  0x4f   :  { %2574 = vmatprep.subr.bf16.mxu1 %v2801_v22  ;;  %v2850_v22 = vld [vmem:[#allocation2 + $0x3d8] sm:$0xff]  }
  0x50   :  { %1847 = vmatmul.mubr.bf16.vlgmr.msra.gmra.mxu0 %v178_v23  ;;  %v2851_v23 = vld [vmem:[#allocation2 + $0x318] sm:$0xff]  }
  0x51   :  { %2553 = vmatpush3.bf16.msra.mxu0 %v2802_v24  ;;  %1887 = vmatmul.mubr.bf16.vlgmr.msra.gmra.mxu1 %v180_v28  ;;  %v2852_v24 = vld [vmem:[#allocation2 + $0x398] sm:$0xff]   ;;  %v2856_v28 = vld [vmem:[#allocation2 + $0x390] sm:$0xff]  }
  0x52   :  { %2554 = vmatprep.subr.bf16.mxu0 %v2804_v29  ;;  %2575 = vmatpush3.bf16.msra.mxu1 %v2803_v27  ;;  %v2855_v27 = vld [vmem:[#allocation2 + $0x310] sm:$0xff]   ;;  %v2857_v29 = vld [vmem:[#allocation2 + $0x348] sm:$0xff]  }
  0x53   :  { %2576 = vmatprep.subr.bf16.mxu1 %v2805_v31  ;;  %1926 = vmatprep.mubr.bf16.mxu0 %v183_v4  ;;  %v2859_v31 = vld [vmem:[#allocation2 + $0x308] sm:$0xff]   ;;  %v2885_v4 = vld [vmem:[#allocation2 + $0x498] sm:$0xff]  }
  0x54   :  { %1966 = vmatprep.mubr.bf16.mxu1 %v185_v9  ;;  %v2891_v9 = vld [vmem:[#allocation2 + $0x4c8] sm:$0xff]  }
  0x55   :  { %2555 = vmatpush3.bf16.msra.mxu0 %v2806_v32  ;;  %v2860_v32 = vld [vmem:[#allocation2 + $0x388] sm:$0xff]  }
  0x56   :  { %2556 = vmatprep.subr.bf16.mxu0 %v2808_v34  ;;  %2577 = vmatpush3.bf16.msra.mxu1 %v2807_v33  ;;  %v2861_v33 = vld [vmem:[#allocation2 + $0x340] sm:$0xff]  }
  0x57   :  { %2578 = vmatprep.subr.bf16.mxu1 %v2809_v36  ;;  %v2862_v34 = vld [vmem:[#allocation2 + $0x3c0] sm:$0xff]  }
  0x58   :  { %v2863_v36 = vld [vmem:[#allocation2 + $0x300] sm:$0xff]  }
  0x59   :  { %2557 = vmatpush3.bf16.msra.mxu0 %v2810_v37  ;;  %v39_v37 = vld [vmem:[%s3051_s0 + $0x18] sm:$0xff] }
  0x5a   :  { %2558 = vmatprep.subr.bf16.mxu0 %v2812_v39  ;;  %2579 = vmatpush3.bf16.msra.mxu1 %v2811_v38  ;;  %v106_v38 = vrot.slane %v39_v37, %v3007_v35  ;;  %v99_v39 = vcombine.high %v39_v37, %v39_v37  ;;  %v2909_v37 = vld [vmem:[#allocation2 + $0x528] sm:$0xff]  }
  0x5b   :  { %2580 = vmatprep.subr.bf16.mxu1 %v2813_v40  ;;  %v2866_v40 = vld [vmem:[#allocation2 + $0x478] sm:$0xff]  }
  0x5d   :  { %2559 = vmatpush3.bf16.msra.mxu0 %v2814_v41  ;;  %v2864_v41 = vld [vmem:[#allocation2 + $0x380] sm:$0xff]  }
  0x5e   :  { %2560 = vmatprep.subr.bf16.mxu0 %v2816_v43  ;;  %2581 = vmatpush3.bf16.msra.mxu1 %v2815_v42  ;;  %v114_v42 = vcombine.high %v106_v38, %v106_v38  ;;  %v113_v43 = vrot.slane %v99_v39, %v3007_v35  ;;  %v2910_v39 = vld [vmem:[#allocation2 + $0x5a8] sm:$0xff]  }
  0x5f   :  { %2582 = vmatprep.subr.bf16.mxu1 %v2817_v44  ;;  %v2867_v44 = vld [vmem:[#allocation2 + $0x4f8] sm:$0xff]  }
  0x61   :  { %2561 = vmatpush3.bf16.msra.mxu0 %v2818_v45  ;;  %v186_v45 = vpack.c.bf16 %v106_v38, %v106_v38  ;;  %v2911_v38 = vld [vmem:[#allocation2 + $0x560] sm:$0xff]  }
  0x62   :  { %2562 = vmatprep.subr.bf16.mxu0 %v2820_v47  ;;  %2583 = vmatpush3.bf16.msra.mxu1 %v2819_v46  ;;  %v187_v46 = vpack.c.bf16 %v114_v42, %v114_v42  ;;  %v115_v47 = vcombine.high %v113_v43, %v113_v43  ;;  %v2915_v42 = vld [vmem:[#allocation2 + $0x558] sm:$0xff]  }
  0x63   :  { %2584 = vmatprep.subr.bf16.mxu1 %v2821_v48  ;;  %v2868_v48 = vld [vmem:[#allocation2 + $0x438] sm:$0xff]  }
  0x65   :  { %2563 = vmatpush3.bf16.msra.mxu0 %v2822_v49  ;;  %v188_v49 = vpack.c.bf16 %v113_v43, %v113_v43  ;;  %v2914_v43 = vld [vmem:[#allocation2 + $0x5a0] sm:$0xff]  }
  0x66   :  { %2564 = vmatprep.subr.bf16.mxu0 %v2824_v51  ;;  %2585 = vmatpush3.bf16.msra.mxu1 %v2823_v50  ;;  %v2870_v50 = vld [vmem:[#allocation2 + $0x470] sm:$0xff]   ;;  %v189_v51 = vpack.c.bf16 %v115_v47, %v115_v47  ;;  %v2918_v47 = vld [vmem:[#allocation2 + $0x598] sm:$0xff]  }
  0x67   :  { %2586 = vmatprep.subr.bf16.mxu1 %v2825_v52  ;;  %v2869_v52 = vld [vmem:[#allocation2 + $0x4b8] sm:$0xff]  }
  0x69   :  { %2565 = vmatpush3.bf16.msra.mxu0 %v2826_v53  ;;  %v2871_v53 = vld [vmem:[#allocation2 + $0x4f0] sm:$0xff]  }
  0x6a   :  { %2566 = vmatprep.subr.bf16.mxu0 %v2828_v55  ;;  %2587 = vmatpush3.bf16.msra.mxu1 %v2827_v54  ;;  %v2872_v54 = vld [vmem:[#allocation2 + $0x430] sm:$0xff]   ;;  %v2874_v55 = vld [vmem:[#allocation2 + $0x468] sm:$0xff]  }
  0x6b   :  { %2588 = vmatprep.subr.bf16.mxu1 %v2829_v56  ;;  %v2873_v56 = vld [vmem:[#allocation2 + $0x4b0] sm:$0xff]  }
  0x6d   :  { %2567 = vmatpush3.bf16.msra.mxu0 %v2830_v57  ;;  %v2875_v57 = vld [vmem:[#allocation2 + $0x4e8] sm:$0xff]  }
  0x6e   :  { %2596 = vmatprep.subr.bf16.mxu0 %v2833_v62  ;;  %2589 = vmatpush3.bf16.msra.mxu1 %v2831_v59  ;;  %v2878_v59 = vld [vmem:[#allocation2 + $0x460] sm:$0xff]  }
  0x6f   :  { %2618 = vmatprep.subr.bf16.mxu1 %v2834_v1  ;;  %v2880_v62 = vld [vmem:[#allocation2 + $0x420] sm:$0xff]   ;;  %v2883_v1 = vld [vmem:[#allocation2 + $0x4d8] sm:$0xff]  }
  0x70   :  { %1927 = vmatmul.mubr.bf16.vlgmr.msra.gmra.mxu0 %v182_v2  ;;  %v2884_v2 = vld [vmem:[#allocation2 + $0x418] sm:$0xff]  }
  0x71   :  { %2597 = vmatpush3.bf16.msra.mxu0 %v2835_v3  ;;  %1967 = vmatmul.mubr.bf16.vlgmr.msra.gmra.mxu1 %v184_v7  ;;  %v2886_v3 = vld [vmem:[#allocation2 + $0x450] sm:$0xff]   ;;  %v2890_v7 = vld [vmem:[#allocation2 + $0x448] sm:$0xff]  }
  0x72   :  { %2598 = vmatprep.subr.bf16.mxu0 %v2837_v8  ;;  %2619 = vmatpush3.bf16.msra.mxu1 %v2836_v6  ;;  %v2888_v6 = vld [vmem:[#allocation2 + $0x410] sm:$0xff]  }
  0x73   :  { %2620 = vmatprep.subr.bf16.mxu1 %v2838_v10  ;;  %2006 = vmatprep.mubr.bf16.mxu0 %v187_v46  ;;  %v2889_v8 = vld [vmem:[#allocation2 + $0x490] sm:$0xff]   ;;  %v2892_v10 = vld [vmem:[#allocation2 + $0x408] sm:$0xff]  }
  0x74   :  { %2046 = vmatprep.mubr.bf16.mxu1 %v189_v51  ;;  %v2919_v46 = vld [vmem:[#allocation2 + $0x550] sm:$0xff]  }
  0x75   :  { %2599 = vmatpush3.bf16.msra.mxu0 %v2839_v11  ;;  %v2894_v11 = vld [vmem:[#allocation2 + $0x440] sm:$0xff]   ;;  %v2922_v51 = vld [vmem:[#allocation2 + $0x590] sm:$0xff]  }
  0x76   :  { %2600 = vmatprep.subr.bf16.mxu0 %v2841_v13  ;;  %2621 = vmatpush3.bf16.msra.mxu1 %v2840_v12  ;;  %v2893_v12 = vld [vmem:[#allocation2 + $0x488] sm:$0xff]   ;;  %v2895_v13 = vld [vmem:[#allocation2 + $0x4c0] sm:$0xff]  }
  0x77   :  { %2622 = vmatprep.subr.bf16.mxu1 %v2842_v14  ;;  %v40_v14 = vld [vmem:[%s3051_s0 + $0x20] sm:$0xff] }
  0x79   :  { %2601 = vmatpush3.bf16.msra.mxu0 %v2843_v15  ;;  %v2896_v15 = vld [vmem:[#allocation2 + $0x400] sm:$0xff]  }
  0x7a   :  { %2602 = vmatprep.subr.bf16.mxu0 %v2845_v17  ;;  %2623 = vmatpush3.bf16.msra.mxu1 %v2844_v16  ;;  %v123_v16 = vrot.slane %v40_v14, %v3007_v35  ;;  %v116_v17 = vcombine.high %v40_v14, %v40_v14 }
  0x7b   :  { %2624 = vmatprep.subr.bf16.mxu1 %v2846_v18  ;;  %v2899_v18 = vld [vmem:[#allocation2 + $0x578] sm:$0xff]  }
  0x7d   :  { %2603 = vmatpush3.bf16.msra.mxu0 %v2847_v19  ;;  %v2897_v19 = vld [vmem:[#allocation2 + $0x480] sm:$0xff]  }
  0x7e   :  { %2604 = vmatprep.subr.bf16.mxu0 %v2849_v21  ;;  %2625 = vmatpush3.bf16.msra.mxu1 %v2848_v20  ;;  %v131_v20 = vcombine.high %v123_v16, %v123_v16  ;;  %v130_v21 = vrot.slane %v116_v17, %v3007_v35 }
  0x7f   :  { %2626 = vmatprep.subr.bf16.mxu1 %v2850_v22  ;;  %v190_v22 = vpack.c.bf16 %v123_v16, %v123_v16 }
  0x81   :  { %2605 = vmatpush3.bf16.msra.mxu0 %v2851_v23  ;;  %v2900_v23 = vld [vmem:[#allocation2 + $0x5f8] sm:$0xff]  }
  0x82   :  { %2606 = vmatprep.subr.bf16.mxu0 %v2853_v25  ;;  %2627 = vmatpush3.bf16.msra.mxu1 %v2852_v24  ;;  %v191_v24 = vpack.c.bf16 %v131_v20, %v131_v20  ;;  %v132_v25 = vcombine.high %v130_v21, %v130_v21 }
  0x83   :  { %2628 = vmatprep.subr.bf16.mxu1 %v2854_v26  ;;  %v2901_v26 = vld [vmem:[#allocation2 + $0x538] sm:$0xff]  }
  0x85   :  { %2607 = vmatpush3.bf16.msra.mxu0 %v2855_v27  ;;  %v192_v27 = vpack.c.bf16 %v130_v21, %v130_v21  ;;  %v2982_v21 = vmov 0.0  }
  0x86   :  { %2608 = vmatprep.subr.bf16.mxu0 %v2857_v29  ;;  %2629 = vmatpush3.bf16.msra.mxu1 %v2856_v28  ;;  %v2903_v28 = vld [vmem:[#allocation2 + $0x570] sm:$0xff]   ;;  %v193_v29 = vpack.c.bf16 %v132_v25, %v132_v25  ;;  %34 = vst [vmem:[#allocation5] sm:$0x3] %v2982_v21 }
  0x87   :  { %2630 = vmatprep.subr.bf16.mxu1 %v2858_v30  ;;  %v2902_v30 = vld [vmem:[#allocation2 + $0x5b8] sm:$0xff]  }
  0x89   :  { %2609 = vmatpush3.bf16.msra.mxu0 %v2859_v31  ;;  %v2904_v31 = vld [vmem:[#allocation2 + $0x5f0] sm:$0xff]  }
  0x8a   :  { %2610 = vmatprep.subr.bf16.mxu0 %v2861_v33  ;;  %2631 = vmatpush3.bf16.msra.mxu1 %v2860_v32  ;;  %v2905_v32 = vld [vmem:[#allocation2 + $0x530] sm:$0xff]   ;;  %v2907_v33 = vld [vmem:[#allocation2 + $0x568] sm:$0xff]  }
  0x8b   :  { %2632 = vmatprep.subr.bf16.mxu1 %v2862_v34  ;;  %v2906_v34 = vld [vmem:[#allocation2 + $0x5b0] sm:$0xff]  }
  0x8d   :  { %2611 = vmatpush3.bf16.msra.mxu0 %v2863_v36  ;;  %v2908_v36 = vld [vmem:[#allocation2 + $0x5e8] sm:$0xff]  }
  0x8e   :  { %2640 = vmatprep.subr.bf16.mxu0 %v2866_v40  ;;  %2633 = vmatpush3.bf16.msra.mxu1 %v2864_v41  ;;  %v2912_v40 = vld [vmem:[#allocation2 + $0x5e0] sm:$0xff]  }
  0x8f   :  { %2662 = vmatprep.subr.bf16.mxu1 %v2867_v44  ;;  %v2913_v41 = vld [vmem:[#allocation2 + $0x520] sm:$0xff]   ;;  %v2916_v44 = vld [vmem:[#allocation2 + $0x5d8] sm:$0xff]  }
  0x90   :  { %2007 = vmatmul.mubr.bf16.vlgmr.msra.gmra.mxu0 %v186_v45  ;;  %v2917_v45 = vld [vmem:[#allocation2 + $0x518] sm:$0xff]  }
  0x91   :  { %2641 = vmatpush3.bf16.msra.mxu0 %v2868_v48  ;;  %2047 = vmatmul.mubr.bf16.vlgmr.msra.gmra.mxu1 %v188_v49  ;;  %v2920_v48 = vld [vmem:[#allocation2 + $0x5d0] sm:$0xff]  }
  0x92   :  { %2642 = vmatprep.subr.bf16.mxu0 %v2870_v50  ;;  %2663 = vmatpush3.bf16.msra.mxu1 %v2869_v52  ;;  %v2921_v49 = vld [vmem:[#allocation2 + $0x510] sm:$0xff]   ;;  %v2923_v50 = vld [vmem:[#allocation2 + $0x548] sm:$0xff]  }
  0x93   :  { %2664 = vmatprep.subr.bf16.mxu1 %v2871_v53  ;;  %2086 = vmatprep.mubr.bf16.mxu0 %v191_v24  ;;  %v2924_v52 = vld [vmem:[#allocation2 + $0x5c8] sm:$0xff]  }
  0x94   :  { %2126 = vmatprep.mubr.bf16.mxu1 %v193_v29  ;;  %v2925_v53 = vld [vmem:[#allocation2 + $0x508] sm:$0xff]  }
  0x95   :  { %2643 = vmatpush3.bf16.msra.mxu0 %v2872_v54  ;;  %v2927_v54 = vld [vmem:[#allocation2 + $0x540] sm:$0xff]  }
  0x96   :  { %2644 = vmatprep.subr.bf16.mxu0 %v2874_v55  ;;  %2665 = vmatpush3.bf16.msra.mxu1 %v2873_v56  ;;  %v2926_v55 = vld [vmem:[#allocation2 + $0x588] sm:$0xff]   ;;  %v2928_v56 = vld [vmem:[#allocation2 + $0x5c0] sm:$0xff]  }
  0x97   :  { %2666 = vmatprep.subr.bf16.mxu1 %v2875_v57  ;;  %v41_v57 = vld [vmem:[%s3051_s0 + $0x28] sm:$0xff] }
  0x99   :  { %2645 = vmatpush3.bf16.msra.mxu0 %v2876_v58  ;;  %v2929_v58 = vld [vmem:[#allocation2 + $0x500] sm:$0xff]  }
  0x9a   :  { %2646 = vmatprep.subr.bf16.mxu0 %v2878_v59  ;;  %2667 = vmatpush3.bf16.msra.mxu1 %v2877_v60  ;;  %v140_v59 = vrot.slane %v41_v57, %v3007_v35  ;;  %v133_v60 = vcombine.high %v41_v57, %v41_v57 }
  0x9b   :  { %2668 = vmatprep.subr.bf16.mxu1 %v2879_v61  ;;  %v2930_v61 = vld [vmem:[#allocation2 + $0x580] sm:$0xff]  }
  0x9d   :  { %2647 = vmatpush3.bf16.msra.mxu0 %v2880_v62  ;;  %v148_v62 = vcombine.high %v140_v59, %v140_v59 }
  0x9e   :  { %2648 = vmatprep.subr.bf16.mxu0 %v2882_v63  ;;  %2669 = vmatpush3.bf16.msra.mxu1 %v2881_v0  ;;  %v147_v63 = vrot.slane %v133_v60, %v3007_v35  ;;  %v194_v0 = vpack.c.bf16 %v140_v59, %v140_v59 }
  0x9f   :  { %2670 = vmatprep.subr.bf16.mxu1 %v2883_v1  ;;  %v195_v1 = vpack.c.bf16 %v148_v62, %v148_v62 }
  0xa1   :  { %2649 = vmatpush3.bf16.msra.mxu0 %v2884_v2  ;;  %v149_v2 = vcombine.high %v147_v63, %v147_v63 }
  0xa2   :  { %2650 = vmatprep.subr.bf16.mxu0 %v2886_v3  ;;  %2671 = vmatpush3.bf16.msra.mxu1 %v2885_v4  ;;  %v196_v3 = vpack.c.bf16 %v147_v63, %v147_v63 }
  0xa3   :  { %2672 = vmatprep.subr.bf16.mxu1 %v2887_v5  ;;  %v197_v4 = vpack.c.bf16 %v149_v2, %v149_v2 }
  0xa5   :  { %2651 = vmatpush3.bf16.msra.mxu0 %v2888_v6 }
  0xa6   :  { %2652 = vmatprep.subr.bf16.mxu0 %v2890_v7  ;;  %2673 = vmatpush3.bf16.msra.mxu1 %v2889_v8 }
  0xa7   :  { %2674 = vmatprep.subr.bf16.mxu1 %v2891_v9 }
  0xa9   :  { %2653 = vmatpush3.bf16.msra.mxu0 %v2892_v10 }
  0xaa   :  { %2654 = vmatprep.subr.bf16.mxu0 %v2894_v11  ;;  %2675 = vmatpush3.bf16.msra.mxu1 %v2893_v12 }
  0xab   :  { %2676 = vmatprep.subr.bf16.mxu1 %v2895_v13 }
  0xad   :  { %2655 = vmatpush3.bf16.msra.mxu0 %v2896_v15 }
  0xae   :  { %2684 = vmatprep.subr.bf16.mxu0 %v2899_v18  ;;  %2677 = vmatpush3.bf16.msra.mxu1 %v2897_v19 }
  0xaf   :  { %2706 = vmatprep.subr.bf16.mxu1 %v2900_v23 }
  0xb0   :  { %2087 = vmatmul.mubr.bf16.vlgmr.msra.gmra.mxu0 %v190_v22 }
  0xb1   :  { %2685 = vmatpush3.bf16.msra.mxu0 %v2901_v26  ;;  %2127 = vmatmul.mubr.bf16.vlgmr.msra.gmra.mxu1 %v192_v27 }
  0xb2   :  { %2686 = vmatprep.subr.bf16.mxu0 %v2903_v28  ;;  %2707 = vmatpush3.bf16.msra.mxu1 %v2902_v30 }
  0xb3   :  { %2708 = vmatprep.subr.bf16.mxu1 %v2904_v31  ;;  %2166 = vmatprep.mubr.bf16.mxu0 %v195_v1 }
  0xb4   :  { %2206 = vmatprep.mubr.bf16.mxu1 %v197_v4 }
  0xb5   :  { %2687 = vmatpush3.bf16.msra.mxu0 %v2905_v32 }
  0xb6   :  { %2688 = vmatprep.subr.bf16.mxu0 %v2907_v33  ;;  %2709 = vmatpush3.bf16.msra.mxu1 %v2906_v34 }
  0xb7   :  { %2710 = vmatprep.subr.bf16.mxu1 %v2908_v36 }
  0xb9   :  { %2689 = vmatpush3.bf16.msra.mxu0 %v2909_v37 }
  0xba   :  { %2690 = vmatprep.subr.bf16.mxu0 %v2911_v38  ;;  %2711 = vmatpush3.bf16.msra.mxu1 %v2910_v39 }
  0xbb   :  { %2712 = vmatprep.subr.bf16.mxu1 %v2912_v40 }
  0xbd   :  { %2691 = vmatpush3.bf16.msra.mxu0 %v2913_v41 }
  0xbe   :  { %2692 = vmatprep.subr.bf16.mxu0 %v2915_v42  ;;  %2713 = vmatpush3.bf16.msra.mxu1 %v2914_v43 }
  0xbf   :  { %2714 = vmatprep.subr.bf16.mxu1 %v2916_v44 }
  0xc1   :  { %2693 = vmatpush3.bf16.msra.mxu0 %v2917_v45 }
  0xc2   :  { %2694 = vmatprep.subr.bf16.mxu0 %v2919_v46  ;;  %2715 = vmatpush3.bf16.msra.mxu1 %v2918_v47 }
  0xc3   :  { %2716 = vmatprep.subr.bf16.mxu1 %v2920_v48 }
  0xc5   :  { %2695 = vmatpush3.bf16.msra.mxu0 %v2921_v49 }
  0xc6   :  { %2696 = vmatprep.subr.bf16.mxu0 %v2923_v50  ;;  %2717 = vmatpush3.bf16.msra.mxu1 %v2922_v51 }
  0xc7   :  { %2718 = vmatprep.subr.bf16.mxu1 %v2924_v52 }
  0xc9   :  { %2697 = vmatpush3.bf16.msra.mxu0 %v2925_v53 }
  0xca   :  { %2698 = vmatprep.subr.bf16.mxu0 %v2927_v54  ;;  %2719 = vmatpush3.bf16.msra.mxu1 %v2926_v55 }
  0xcb   :  { %2720 = vmatprep.subr.bf16.mxu1 %v2928_v56 }
  0xcd   :  { %2699 = vmatpush3.bf16.msra.mxu0 %v2929_v58 }
  0xce   :  { %2721 = vmatpush3.bf16.msra.mxu1 %v2930_v61 }
  0xd0   :  { %2167 = vmatmul.mubr.bf16.vlgmr.msra.gmra.mxu0 %v194_v0 }
  0xd1   :  { %2207 = vmatmul.mubr.bf16.vlgmr.msra.gmra.mxu1 %v196_v3 }
  0xf0   :  { %v2480_v5 = vpop.f32.mrf.mxu0 }
  0xf1   :  { %v2502_v6 = vpop.f32.mrf.mxu1 }
  0xf2   :  { %v2481_v7 = vpop.f32.mrf.mxu0 }
  0xf3   :  { %v2482_v8 = vadd.f32 %v2481_v7, %v2480_v5  ;;  %v2503_v9 = vpop.f32.mrf.mxu1 }
  0xf4   :  { %v2483_v10 = vpop.f32.mrf.mxu0  ;;  %v2504_v11 = vadd.f32 %v2503_v9, %v2502_v6  ;;  %v35_v9 = vld [vmem:[#allocation5] sm:$0x3] }
  0xf5   :  { %v2505_v35 = vpop.f32.mrf.mxu1 }
  0xf6   :  { %v2484_v12 = vpop.f32.mrf.mxu0  ;;  %v1809_v13 = vadd.f32 %v2504_v11, %v2482_v8 }
  0xf7   :  { %v2506_v14 = vpop.f32.mrf.mxu1 }
  0xf8   :  { %v2461_v14 = vld [vmem:[%s3053_s2] ss:$0 sm:$0xff] }
 0x110   :  { %v2524_v15 = vpop.f32.mrf.mxu0 }
 0x111   :  { %v2546_v16 = vpop.f32.mrf.mxu1 }
 0x112   :  { %v2525_v17 = vpop.f32.mrf.mxu0 }
 0x113   :  { %v2526_v18 = vadd.f32 %v2525_v17, %v2524_v15  ;;  %v2547_v19 = vpop.f32.mrf.mxu1 }
 0x114   :  { %v2527_v20 = vpop.f32.mrf.mxu0  ;;  %v2548_v23 = vadd.f32 %v2547_v19, %v2546_v16 }
 0x115   :  { %v1849_v22 = vadd.f32 %v2526_v18, %v1809_v13  ;;  %v2549_v24 = vpop.f32.mrf.mxu1 }
 0x116   :  { %v2528_v25 = vpop.f32.mrf.mxu0 }
 0x117   :  { %v1889_v26 = vadd.f32 %v2548_v23, %v1849_v22  ;;  %v2550_v27 = vpop.f32.mrf.mxu1 }
 0x118   :  { %v2462_v27 = vld [vmem:[%s3053_s2 + $0x1] ss:$0 sm:$0xff] }
 0x130   :  { %v2568_v28 = vpop.f32.mrf.mxu0 }
 0x131   :  { %v2590_v29 = vpop.f32.mrf.mxu1 }
 0x132   :  { %v2569_v30 = vpop.f32.mrf.mxu0 }
 0x133   :  { %v2570_v31 = vadd.f32 %v2569_v30, %v2568_v28  ;;  %v2591_v32 = vpop.f32.mrf.mxu1 }
 0x134   :  { %v2571_v33 = vpop.f32.mrf.mxu0  ;;  %v2592_v36 = vadd.f32 %v2591_v32, %v2590_v29  ;;  %v2463_v29 = vld [vmem:[%s3053_s2 + $0x2] ss:$0 sm:$0xff] }
 0x135   :  { %v1929_v34 = vadd.f32 %v2570_v31, %v1889_v26  ;;  %v2593_v37 = vpop.f32.mrf.mxu1 }
 0x136   :  { %v2572_v38 = vpop.f32.mrf.mxu0 }
 0x137   :  { %v1969_v39 = vadd.f32 %v2592_v36, %v1929_v34  ;;  %v2594_v40 = vpop.f32.mrf.mxu1 }
 0x150   :  { %v2612_v41 = vpop.f32.mrf.mxu0 }
 0x151   :  { %v2634_v42 = vpop.f32.mrf.mxu1 }
 0x152   :  { %v2613_v43 = vpop.f32.mrf.mxu0 }
 0x153   :  { %v2635_v44 = vpop.f32.mrf.mxu1  ;;  %v2614_v57 = vadd.f32 %v2613_v43, %v2612_v41 }
 0x154   :  { %v2615_v45 = vpop.f32.mrf.mxu0  ;;  %v2636_v59 = vadd.f32 %v2635_v44, %v2634_v42 }
 0x155   :  { %v2637_v46 = vpop.f32.mrf.mxu1  ;;  %v2009_v58 = vadd.f32 %v2614_v57, %v1969_v39 }
 0x156   :  { %v2616_v47 = vpop.f32.mrf.mxu0 }
 0x157   :  { %v2638_v48 = vpop.f32.mrf.mxu1  ;;  %v2049_v61 = vadd.f32 %v2636_v59, %v2009_v58 }
 0x170   :  { %v2656_v49 = vpop.f32.mrf.mxu0 }
 0x171   :  { %v2678_v50 = vpop.f32.mrf.mxu1 }
 0x172   :  { %v2657_v51 = vpop.f32.mrf.mxu0 }
 0x173   :  { %v2679_v52 = vpop.f32.mrf.mxu1  ;;  %v2658_v60 = vadd.f32 %v2657_v51, %v2656_v49 }
 0x174   :  { %v2659_v53 = vpop.f32.mrf.mxu0  ;;  %v2680_v63 = vadd.f32 %v2679_v52, %v2678_v50 }
 0x175   :  { %v2681_v54 = vpop.f32.mrf.mxu1  ;;  %v2089_v62 = vadd.f32 %v2658_v60, %v2049_v61 }
 0x176   :  { %v2660_v55 = vpop.f32.mrf.mxu0 }
 0x177   :  { %v2682_v56 = vpop.f32.mrf.mxu1  ;;  %v2129_v3 = vadd.f32 %v2680_v63, %v2089_v62 }
 0x190   :  { %v2700_v0 = vpop.f32.mrf.mxu0 }
 0x191   :  { %v2722_v1 = vpop.f32.mrf.mxu1 }
 0x192   :  { %v2701_v2 = vpop.f32.mrf.mxu0 }
 0x193   :  { %v2702_v4 = vadd.f32 %v2701_v2, %v2700_v0  ;;  %v2723_v5 = vpop.f32.mrf.mxu1 }
 0x194   :  { %v2703_v6 = vpop.f32.mrf.mxu0  ;;  %v2724_v8 = vadd.f32 %v2723_v5, %v2722_v1 }
 0x195   :  { %v2169_v7 = vadd.f32 %v2702_v4, %v2129_v3  ;;  %v2725_v10 = vpop.f32.mrf.mxu1 }
 0x196   :  { %v2704_v11 = vpop.f32.mrf.mxu0 }
 0x197   :  { %v2209_v35 = vadd.f32 %v2724_v8, %v2169_v7  ;;  %v2726_v12 = vpop.f32.mrf.mxu1 }
 0x199   :  { %v2214_v13 = vadd.f32 %v2209_v35, %v35_v9 }
 0x19b   :  { %2215 = vst [vmem:[#allocation5] sm:$0x3] %v2214_v13 }
 0x1a2   :  { %v2222_v15 = vld [vmem:[#allocation5] sm:$0x3] }
 0x1a3   :  { %v2227_v16 = vadd.f32 %v2461_v14, %v2222_v15 }
 0x1a5   :  { %v2229_v17 = vsel %vm2228_vm0, %v2227_v16, 0.0 }
 0x1a6   :  { %2230 = vadd.xlane.f32.xlu0 %v2229_v17 }
 0x22f   :  { %v2231_v18 = vpop.xlane.xlu0 %2230 }
 0x230   :  { %v2233_v19 = vmul.f32 0.0078125, %v2231_v18 }
 0x232   :  { %v2234_v20 = vsub.f32 %v2227_v16, %v2233_v19 }
 0x234   :  { %v2235_v21 = vmul.f32 %v2234_v20, %v2234_v20 }
 0x236   :  { %v2236_v22 = vsel %vm2228_vm0, %v2235_v21, 0.0 }
 0x237   :  { %2237 = vadd.xlane.f32.xlu0 %v2236_v22 }
 0x2c0   :  { %v2238_v23 = vpop.xlane.xlu0 %2237 }
 0x2c1   :  { %v2239_v24 = vmul.f32 0.0078125, %v2238_v23 }
 0x2c3   :  { %v2240_v25 = vadd.f32 1e-05, %v2239_v24 }
 0x2c5   :  { %2932 = vrsqrt.f32 %v2240_v25 }
 0x2d2   :  { %v2933_v26 = vpop.eup %2932 }
 0x2d3   :  { %v2242_v28 = vmul.f32 %v2933_v26, %v2234_v20 }
 0x2d5   :  { %v2247_v30 = vmul.f32 %v2462_v27, %v2242_v28 }
 0x2d7   :  { %v2252_v31 = vadd.f32 %v2463_v29, %v2247_v30 }
 0x2d9   :  { %2253 = vst [vmem:[#allocation5] sm:$0x3] %v2252_v31 }
 0x2da   :  { %2965 = shalt.err (!%p2962_p9)
}
 0x2db   :  { %2263 = dma.vmem_to_hbm [thread:$0]  %s2261_s9, 32, %s3054_s3, [#allocation4]  }
 0x2dc   :  { %2976 = dma.done.wait [#allocation4], 32  }
 0x2dd   :  { %2977 = vsyncadd [#allocation4], 4294967264 }
 0x2de   :  { %2267 = vsyncpa [#allocation3], 1 }
 0x2df   :  { %2268 = vsyncpa [#allocation4], 1 }

</bundles_post_ra>
